<compile_context>
chip_gen: v7x
topology: tpu7x:2x2x1
jax: 0.10.0
libtpu: 0.0.40
codegen_flags: <defaults>
</compile_context>

<pallas_src>
import functools

import jax
import jax.numpy as jnp
from jax import lax
from jax.experimental import pallas as pl
from jax.experimental.pallas import tpu as pltpu


def _round_up(x, m):
    return ((x + m - 1) // m) * m


def _tensorcores_per_chip():
    """2 TensorCores on v7x, 1 on v5e/v6e (grid is a serial loop on single-TC chips)."""
    try:
        kind = jax.devices()[0].device_kind.lower()
        if "v7" in kind:
            return 2
    except Exception:
        pass
    return 1


# ----------------------------------------------------------------------------- kernel
def _convblock_kernel(x_ref, w1_ref, b1_ref, w2_ref, b2_ref, o_ref, h_ref,
                      *, bblk, K, L1p, L2p, alpha):
    """One batch block (bblk elements) per grid step.

    x_ref : (bblk*L1p, K*C_in) bf16  conv1 im2col windows (built in the wrapper)
    w1_ref: (K*C_in, Cp)       bf16  conv1 weight, im2col layout
    b1_ref: (1, Cp)            f32   conv1 bias  (zero-padded channels)
    w2_ref: (K*Cp, Cp)         bf16  conv2 weight, im2col layout
    b2_ref: (1, Cp)            f32   conv2 bias  (zero-padded channels)
    o_ref : (bblk*L2p, Cp)     bf16  output slab (lane-dense: Cp % 128 == 0)
    h_ref : (bblk*L1p, Cp)     f32   scratch: conv1 activations (for strided pooling)
    """
    Cp = w1_ref.shape[1]
    LPfull = L1p // 4
    MP = (bblk * L1p) // 4

    # ---- conv1: one batched MXU matmul for the whole block, bf16 in / f32 accumulate
    h = jnp.dot(x_ref[...], w1_ref[...], preferred_element_type=jnp.float32) + b1_ref[...]
    h_ref[...] = jnp.maximum(h, alpha * h)          # LeakyReLU(0.3) as a 2-op max, f32 VPU

    # ---- MaxPool1d(4), floor mode: 4 sublane-strided loads + pairwise-max tree.
    # L1p % 4 == 0, so stride-4 rows never cross a batch-element boundary.
    p = jnp.maximum(
        jnp.maximum(h_ref[pl.ds(0, MP, stride=4), :], h_ref[pl.ds(1, MP, stride=4), :]),
        jnp.maximum(h_ref[pl.ds(2, MP, stride=4), :], h_ref[pl.ds(3, MP, stride=4), :]))

    # ---- conv2: cast pooled activations to bf16 ONCE, im2col along the lane axis,
    # then one batched MXU matmul (M = bblk*L2p).
    p = p.reshape(bblk, LPfull, Cp).astype(jnp.bfloat16)     # LPfull % 8 == 0 -> aligned reshape
    pw = jnp.concatenate([p[:, k:k + L2p, :] for k in range(K)], axis=-1)   # (bblk, L2p, K*Cp)
    o = jnp.dot(pw.reshape(bblk * L2p, K * Cp), w2_ref[...],
                preferred_element_type=jnp.float32) + b2_ref[...]
    o_ref[...] = o.astype(o_ref.dtype)              # full-tile, lane-dense bf16 store


# ----------------------------------------------------------------------------- wrapper
def _conv_block_impl(x_ncl, w1, b1, w2, b2):
    """PyTorch-semantics ConvBlock forward.

    x_ncl: (B, C_in, L) float32 (PyTorch NCL layout)
    w1   : (CNN, C_in, K)   b1: (CNN,)
    w2   : (CNN, CNN, K)    b2: (CNN,)
    returns (B, CNN, L2) float32 in NCL layout.
    """
    B, C_in, L = x_ncl.shape
    CNN, C_in_w, K = w1.shape
    assert C_in_w == C_in
    L1 = L - K + 1            # conv1 output length
    LP = L1 // 4              # maxpool(4) output length (floor mode)
    L2 = LP - K + 1           # conv2 output length
    assert L2 > 0, "sequence too short for this ConvBlock config"

    LANE = 128
    Cp = _round_up(CNN, LANE)                           # lane-dense padded channel count
    L2p = _round_up(L2, 16)                             # bf16-sublane-aligned conv2 rows
    L1p = _round_up(max(L1, 4 * (K - 1 + L2p)), 32)     # => L1p//4 multiple of 8, covers im2col
    KCin = K * C_in

    # ---- weights / biases -> im2col layout, zero-padded output channels, bf16 for MXU
    w1_mat = jnp.transpose(w1, (2, 1, 0)).reshape(KCin, CNN)          # [k*C_in+c, o]
    w1_mat = jnp.pad(w1_mat, ((0, 0), (0, Cp - CNN))).astype(jnp.bfloat16)
    w2_t = jnp.pad(jnp.transpose(w2, (2, 1, 0)),                      # (K, Cp, Cp)
                   ((0, 0), (0, Cp - CNN), (0, Cp - CNN)))
    w2_mat = w2_t.reshape(K * Cp, Cp).astype(jnp.bfloat16)            # [k*Cp+c, o]
    b1_p = jnp.pad(b1, (0, Cp - CNN)).reshape(1, Cp).astype(jnp.float32)
    b2_p = jnp.pad(b2, (0, Cp - CNN)).reshape(1, Cp).astype(jnp.float32)

    # ---- batch blocking: large blocks amortize the ~0.35us/step pipeline overhead;
    # only 2-TensorCore chips (v7x) force an even, >= 2 step count for core balance.
    ntc = _tensorcores_per_chip()
    rows_target = 4096
    bblk = max(1, min(B, rows_target // L1p))
    if ntc >= 2 and B >= 2:
        nsteps = max(2, pl.cdiv(B, bblk))
        nsteps = pl.cdiv(nsteps, 2) * 2                 # even step count -> balanced TC halves
        bblk = pl.cdiv(B, nsteps)
    Bpad = pl.cdiv(B, bblk) * bblk
    nsteps = Bpad // bblk

    # ---- conv1 im2col hoisted to the wrapper (XLA fuses transpose + concat + pad + cast)
    x_nlc = jnp.transpose(x_ncl, (0, 2, 1))                                      # (B, L, C_in)
    x_win = jnp.concatenate([x_nlc[:, k:k + L1, :] for k in range(K)], axis=-1)  # (B, L1, K*C_in)
    x_win = jnp.pad(x_win.astype(jnp.bfloat16),
                    ((0, Bpad - B), (0, L1p - L1), (0, 0)))
    x_win = x_win.reshape(Bpad * L1p, KCin)

    kernel = functools.partial(_convblock_kernel, bblk=bblk, K=K,
                               L1p=L1p, L2p=L2p, alpha=0.3)

    flops = 2 * Bpad * (L1p * KCin * Cp + L2p * (K * Cp) * Cp)
    bytes_accessed = (x_win.size * 2 + w1_mat.size * 2 + w2_mat.size * 2
                      + (b1_p.size + b2_p.size) * 4 + Bpad * L2p * Cp * 2)

    out_flat = pl.pallas_call(
        kernel,
        out_shape=jax.ShapeDtypeStruct((Bpad * L2p, Cp), jnp.bfloat16),
        grid_spec=pltpu.PrefetchScalarGridSpec(
            num_scalar_prefetch=0,
            grid=(nsteps,),
            in_specs=[
                pl.BlockSpec((bblk * L1p, KCin), lambda i: (i, 0)),
                pl.BlockSpec((KCin, Cp), lambda i: (0, 0)),
                pl.BlockSpec((1, Cp), lambda i: (0, 0)),
                pl.BlockSpec((K * Cp, Cp), lambda i: (0, 0)),
                pl.BlockSpec((1, Cp), lambda i: (0, 0)),
            ],
            out_specs=pl.BlockSpec((bblk * L2p, Cp), lambda i: (i, 0)),
            scratch_shapes=[pltpu.VMEM((bblk * L1p, Cp), jnp.float32)],
        ),
        compiler_params=pltpu.CompilerParams(dimension_semantics=("parallel",)),
        cost_estimate=pl.CostEstimate(flops=flops, transcendentals=0,
                                      bytes_accessed=bytes_accessed),
    )(x_win, w1_mat, b1_p, w2_mat, b2_p)

    # drop row/channel/batch padding, back to f32 + PyTorch NCL layout (tiny tensor)
    out = out_flat.reshape(Bpad, L2p, Cp)[:B, :L2, :CNN].astype(jnp.float32)
    return jnp.transpose(out, (0, 2, 1))


conv_block_pallas = jax.jit(_conv_block_impl)


# ----------------------------------------------------------------------------- reference (pure JAX, f32)
def conv_block_ref(x_ncl, w1, b1, w2, b2):
    dn = ("NCH", "OIH", "NCH")
    h = lax.conv_general_dilated(x_ncl, w1, (1,), "VALID", dimension_numbers=dn,
                                 precision=lax.Precision.HIGHEST)
    h = h + b1[None, :, None]
    h = jnp.where(h > 0, h, 0.3 * h)
    h = lax.reduce_window(h, -jnp.inf, lax.max,
                          window_dimensions=(1, 1, 4),
                          window_strides=(1, 1, 4),
                          padding="VALID")
    o = lax.conv_general_dilated(h, w2, (1,), "VALID", dimension_numbers=dn,
                                 precision=lax.Precision.HIGHEST)
    return o + b2[None, :, None]


# ----------------------------------------------------------------------------- params
def xavier_uniform_conv1d(key, c_out, c_in, k):
    fan_in = c_in * k
    fan_out = c_out * k
    bound = (6.0 / (fan_in + fan_out)) ** 0.5
    return jax.random.uniform(key, (c_out, c_in, k), jnp.float32, -bound, bound)


if __name__ == "__main__":
    # ConvBlock(embed_dim, cnn_size, rnn_size, kernel_size)
    embed_dim, rnn_size, cnn_size, kernel_size = 16, 8, 32, 3
    C_in = 2 * rnn_size + embed_dim        # 32
    B, L = 2, 64

    key = jax.random.PRNGKey(0)
    kx, k1, k2 = jax.random.split(key, 3)

    x = jax.random.normal(kx, (B, C_in, L), jnp.float32)          # NCL input
    w1 = xavier_uniform_conv1d(k1, cnn_size, C_in, kernel_size)
    b1 = jnp.zeros((cnn_size,), jnp.float32)
    w2 = xavier_uniform_conv1d(k2, cnn_size, cnn_size, kernel_size)
    b2 = jnp.zeros((cnn_size,), jnp.float32)

    out = jax.block_until_ready(conv_block_pallas(x, w1, b1, w2, b2))
    ref = jax.block_until_ready(conv_block_ref(x, w1, b1, w2, b2))

    L2 = (L - kernel_size + 1) // 4 - kernel_size + 1
    assert out.shape == ref.shape == (B, cnn_size, L2), (out.shape, ref.shape)
    # bf16 MXU inputs / bf16 output store with f32 accumulation -> relaxed tolerance.
    assert jnp.allclose(out, ref, rtol=5e-2, atol=5e-2), "mismatch vs reference"

    print("KERNEL_OK")
</pallas_src>

<mosaic_0001>
module attributes {stable_mosaic.version = 11 : i64} {
  func.func @_convblock_kernel(%arg0: i32, %arg1: memref<192x96xbf16, #tpu.memory_space<vmem>>, %arg2: memref<96x128xbf16, #tpu.memory_space<vmem>>, %arg3: memref<1x128xf32, #tpu.memory_space<vmem>>, %arg4: memref<384x128xbf16, #tpu.memory_space<vmem>>, %arg5: memref<1x128xf32, #tpu.memory_space<vmem>>, %arg6: memref<32x128xbf16, #tpu.memory_space<vmem>>, %arg7: memref<192x128xf32, #tpu.memory_space<vmem>>) attributes {dimension_semantics = [#tpu.dimension_semantics<parallel>], iteration_bounds = array<i64: 1>, scalar_prefetch = 0 : i64, scratch_operands = 1 : i64, tpu.core_type = #tpu.core_type<tc>, window_params = [{transform_indices = @transform_0, window_bounds = array<i64: 192, 96>}, {pipeline_mode = #tpu.pipeline_mode<synchronous>, transform_indices = @transform_1, window_bounds = array<i64: 96, 128>}, {pipeline_mode = #tpu.pipeline_mode<synchronous>, transform_indices = @transform_2, window_bounds = array<i64: 1, 128>}, {pipeline_mode = #tpu.pipeline_mode<synchronous>, transform_indices = @transform_3, window_bounds = array<i64: 384, 128>}, {pipeline_mode = #tpu.pipeline_mode<synchronous>, transform_indices = @transform_4, window_bounds = array<i64: 1, 128>}, {transform_indices = @transform_5, window_bounds = array<i64: 32, 128>}]} {
    %c0 = arith.constant 0 : index
    %c0_0 = arith.constant 0 : index
    %0 = vector.load %arg1[%c0, %c0_0] : memref<192x96xbf16, #tpu.memory_space<vmem>>, vector<192x96xbf16>
    %c0_1 = arith.constant 0 : index
    %c0_2 = arith.constant 0 : index
    %1 = vector.load %arg2[%c0_1, %c0_2] : memref<96x128xbf16, #tpu.memory_space<vmem>>, vector<96x128xbf16>
    %cst = arith.constant dense<0.000000e+00> : vector<192x128xf32>
    %2 = tpu.matmul %0, %1, %cst {dimension_numbers = #tpu.dot_dimension_numbers<[1], [0], [0], [1], [0, 0, 1, 1], [], []>} : vector<192x96xbf16>, vector<96x128xbf16>, vector<192x128xf32> -> vector<192x128xf32>
    %c0_3 = arith.constant 0 : index
    %c0_4 = arith.constant 0 : index
    %3 = vector.load %arg3[%c0_3, %c0_4] : memref<1x128xf32, #tpu.memory_space<vmem>>, vector<1x128xf32>
    %4 = vector.broadcast %3 : vector<1x128xf32> to vector<192x128xf32>
    %5 = arith.addf %2, %4 : vector<192x128xf32>
    %cst_5 = arith.constant 3.000000e-01 : f32
    %6 = vector.broadcast %cst_5 : f32 to vector<192x128xf32>
    %7 = arith.mulf %6, %5 : vector<192x128xf32>
    %8 = arith.maximumf %5, %7 : vector<192x128xf32>
    %c0_6 = arith.constant 0 : index
    %c0_7 = arith.constant 0 : index
    %9 = vector.load %arg7[%c0_6, %c0_7] : memref<192x128xf32, #tpu.memory_space<vmem>>, vector<192x128xf32>
    tpu.vector_store %arg7[%c0_6, %c0_7], %8 {strides = array<i32>} : memref<192x128xf32, #tpu.memory_space<vmem>>, vector<192x128xf32>,
    %c0_8 = arith.constant 0 : index
    %c0_9 = arith.constant 0 : index
    %10 = tpu.strided_load %arg7[%c0_8, %c0_9] {strides = array<i32: 4, 1>} : memref<192x128xf32, #tpu.memory_space<vmem>>, vector<48x128xf32>
    %c1 = arith.constant 1 : index
    %c0_10 = arith.constant 0 : index
    %11 = tpu.strided_load %arg7[%c1, %c0_10] {strides = array<i32: 4, 1>} : memref<192x128xf32, #tpu.memory_space<vmem>>, vector<48x128xf32>
    %12 = arith.maximumf %10, %11 : vector<48x128xf32>
    %c2 = arith.constant 2 : index
    %c0_11 = arith.constant 0 : index
    %13 = tpu.strided_load %arg7[%c2, %c0_11] {strides = array<i32: 4, 1>} : memref<192x128xf32, #tpu.memory_space<vmem>>, vector<48x128xf32>
    %c3 = arith.constant 3 : index
    %c0_12 = arith.constant 0 : index
    %14 = tpu.strided_load %arg7[%c3, %c0_12] {strides = array<i32: 4, 1>} : memref<192x128xf32, #tpu.memory_space<vmem>>, vector<48x128xf32>
    %15 = arith.maximumf %13, %14 : vector<48x128xf32>
    %16 = arith.maximumf %12, %15 : vector<48x128xf32>
    %17 = vector.shape_cast %16 : vector<48x128xf32> to vector<2x24x128xf32>
    %18 = arith.truncf %17 : vector<2x24x128xf32> to vector<2x24x128xbf16>
    %19 = vector.extract_strided_slice %18 {offsets = [0, 0, 0], sizes = [2, 16, 128], strides = [1, 1, 1]} : vector<2x24x128xbf16> to vector<2x16x128xbf16>
    %20 = vector.extract_strided_slice %18 {offsets = [0, 1, 0], sizes = [2, 16, 128], strides = [1, 1, 1]} : vector<2x24x128xbf16> to vector<2x16x128xbf16>
    %21 = vector.extract_strided_slice %18 {offsets = [0, 2, 0], sizes = [2, 16, 128], strides = [1, 1, 1]} : vector<2x24x128xbf16> to vector<2x16x128xbf16>
    %22 = tpu.concatenate %19, %20, %21 in 2 : vector<2x16x128xbf16>, vector<2x16x128xbf16>, vector<2x16x128xbf16> -> vector<2x16x384xbf16>
    %23 = vector.shape_cast %22 : vector<2x16x384xbf16> to vector<32x384xbf16>
    %c0_13 = arith.constant 0 : index
    %c0_14 = arith.constant 0 : index
    %24 = vector.load %arg4[%c0_13, %c0_14] : memref<384x128xbf16, #tpu.memory_space<vmem>>, vector<384x128xbf16>
    %cst_15 = arith.constant dense<0.000000e+00> : vector<32x128xf32>
    %25 = tpu.matmul %23, %24, %cst_15 {dimension_numbers = #tpu.dot_dimension_numbers<[1], [0], [0], [1], [0, 0, 1, 1], [], []>} : vector<32x384xbf16>, vector<384x128xbf16>, vector<32x128xf32> -> vector<32x128xf32>
    %c0_16 = arith.constant 0 : index
    %c0_17 = arith.constant 0 : index
    %26 = vector.load %arg5[%c0_16, %c0_17] : memref<1x128xf32, #tpu.memory_space<vmem>>, vector<1x128xf32>
    %27 = vector.broadcast %26 : vector<1x128xf32> to vector<32x128xf32>
    %28 = arith.addf %25, %27 : vector<32x128xf32>
    %29 = arith.truncf %28 : vector<32x128xf32> to vector<32x128xbf16>
    %c0_18 = arith.constant 0 : index
    %c0_19 = arith.constant 0 : index
    %30 = vector.load %arg6[%c0_18, %c0_19] : memref<32x128xbf16, #tpu.memory_space<vmem>>, vector<32x128xbf16>
    tpu.vector_store %arg6[%c0_18, %c0_19], %29 {strides = array<i32>} : memref<32x128xbf16, #tpu.memory_space<vmem>>, vector<32x128xbf16>,
    return
  }
  func.func @transform_0(%arg0: i32) -> (i32, i32) {
    %c0_i32 = arith.constant 0 : i32
    %c0_i32_0 = arith.constant 0 : i32
    return %arg0, %c0_i32 : i32, i32
  }
  func.func @transform_1(%arg0: i32) -> (i32, i32) {
    %c0_i32 = arith.constant 0 : i32
    %c0_i32_0 = arith.constant 0 : i32
    %c0_i32_1 = arith.constant 0 : i32
    return %c0_i32, %c0_i32_0 : i32, i32
  }
  func.func @transform_2(%arg0: i32) -> (i32, i32) {
    %c0_i32 = arith.constant 0 : i32
    %c0_i32_0 = arith.constant 0 : i32
    %c0_i32_1 = arith.constant 0 : i32
    return %c0_i32, %c0_i32_0 : i32, i32
  }
  func.func @transform_3(%arg0: i32) -> (i32, i32) {
    %c0_i32 = arith.constant 0 : i32
    %c0_i32_0 = arith.constant 0 : i32
    %c0_i32_1 = arith.constant 0 : i32
    return %c0_i32, %c0_i32_0 : i32, i32
  }
  func.func @transform_4(%arg0: i32) -> (i32, i32) {
    %c0_i32 = arith.constant 0 : i32
    %c0_i32_0 = arith.constant 0 : i32
    %c0_i32_1 = arith.constant 0 : i32
    return %c0_i32, %c0_i32_0 : i32, i32
  }
  func.func @transform_5(%arg0: i32) -> (i32, i32) {
    %c0_i32 = arith.constant 0 : i32
    %c0_i32_0 = arith.constant 0 : i32
    return %arg0, %c0_i32 : i32, i32
  }
}

</mosaic_0001>

<bundles_post_ra>
// kernel: _conv_block_impl.1
= control target key start
LH: loop header
LB: loop body
LE: loop exit
PB: predicated region body
PF: predicated region fallthrough
CT: control target
= control target key end

     0   :  { %vm160_vm0 = vcmask 785408   ;;  %vm467_vm1 = vsmask.f32 7424  ;;  %vm498_vm2 = vcmask 1046528   ;;  %s1279_s1 = inlined_call_operand.vmem [shape: bf16[96,128], index: 1, kind: input, shape index: {}]   ;;  %s1280_s0 = inlined_call_operand.vmem [shape: bf16[192,96], index: 0, kind: input, shape index: {}]   ;;  %s1281_s3 = inlined_call_operand.vmem [shape: bf16[384,128], index: 3, kind: input, shape index: {}]   ;;  %s1282_s2 = inlined_call_operand.vmem [shape: f32[1,128], index: 2, kind: input, shape index: {}]   ;;  %s1283_s4 = inlined_call_operand.vmem [shape: f32[1,128], index: 4, kind: input, shape index: {}]   ;;  %s1284_s5 = inlined_call_operand.vmem [shape: bf16[32,128], index: 5, kind: output, shape index: {}]  }
   0x1   :  { %v1015_v0 = vld [vmem:[%s1279_s1] sm:$0xff]   ;;  %v1016_v1 = vld [vmem:[%s1279_s1 + $0x8] sm:$0xff]   ;;  %v1017_v2 = vld [vmem:[%s1279_s1 + $0x10] sm:$0xff]  }
   0x2   :  { %959 = vmatprep.subr.bf16.mxu0 %v1015_v0  ;;  %v1021_v3 = vld [vmem:[%s1280_s0] sm:$0xff]   ;;  %v1018_v4 = vld [vmem:[%s1279_s1 + $0x18] sm:$0xff]   ;;  %v1020_v6 = vld [vmem:[%s1279_s1 + $0x28] sm:$0xff]  }
   0x3   :  { %960 = vmatpush3.bf16.msra.mxu0 %v1015_v0  ;;  %971 = vmatprep.mubr.msk.bf16.mxu0 %vm160_vm0, %v1021_v3  ;;  %v1019_v5 = vld [vmem:[%s1279_s1 + $0x20] sm:$0xff]   ;;  %v1022_v7 = vld [vmem:[%s1280_s0 + $0x8] sm:$0xff]   ;;  %v1023_v8 = vld [vmem:[%s1280_s0 + $0x10] sm:$0xff]  }
   0x4   :  { %961 = vmatprep.subr.bf16.mxu0 %v1016_v1  ;;  %v1024_v9 = vld [vmem:[%s1280_s0 + $0x18] sm:$0xff]   ;;  %v1025_v10 = vld [vmem:[%s1280_s0 + $0x20] sm:$0xff]   ;;  %v1026_v11 = vld [vmem:[%s1280_s0 + $0x28] sm:$0xff]  }
   0x5   :  { %v1027_v12 = vld [vmem:[%s1280_s0 + $0x30] sm:$0xff]   ;;  %v1028_v13 = vld [vmem:[%s1280_s0 + $0x38] sm:$0xff]   ;;  %v1029_v14 = vld [vmem:[%s1280_s0 + $0x40] sm:$0xff]  }
   0x6   :  { %v1030_v15 = vld [vmem:[%s1280_s0 + $0x48] sm:$0xff]   ;;  %v1031_v16 = vld [vmem:[%s1280_s0 + $0x50] sm:$0xff]   ;;  %v1032_v17 = vld [vmem:[%s1280_s0 + $0x58] sm:$0xff]  }
   0x7   :  { %962 = vmatpush3.bf16.msra.mxu0 %v1016_v1  ;;  %v1033_v18 = vld [vmem:[%s1281_s3 + $0x40] sm:$0xff]   ;;  %v1035_v20 = vld [vmem:[%s1281_s3 + $0x48] sm:$0xff]   ;;  %v1037_v22 = vld [vmem:[%s1281_s3 + $0x50] sm:$0xff]  }
   0x8   :  { %963 = vmatprep.subr.bf16.mxu0 %v1017_v2  ;;  %v1034_v19 = vld [vmem:[%s1281_s3] sm:$0xff]   ;;  %921 = vmatprep.subr.bf16.mxu1 %v1033_v18  ;;  %v1036_v21 = vld [vmem:[%s1281_s3 + $0x8] sm:$0xff]   ;;  %v1038_v23 = vld [vmem:[%s1281_s3 + $0x10] sm:$0xff]  }
   0x9   :  { %922 = vmatpush3.bf16.msra.mxu1 %v1034_v19  ;;  %v1039_v24 = vld [vmem:[%s1281_s3 + $0x58] sm:$0xff]   ;;  %v1041_v26 = vld [vmem:[%s1281_s3 + $0x60] sm:$0xff]   ;;  %v1043_v28 = vld [vmem:[%s1281_s3 + $0x68] sm:$0xff]  }
   0xa   :  { %923 = vmatprep.subr.bf16.mxu1 %v1035_v20  ;;  %v1040_v25 = vld [vmem:[%s1281_s3 + $0x18] sm:$0xff]   ;;  %v1042_v27 = vld [vmem:[%s1281_s3 + $0x20] sm:$0xff]   ;;  %v1044_v29 = vld [vmem:[%s1281_s3 + $0x28] sm:$0xff]  }
   0xb   :  { %964 = vmatpush3.bf16.msra.mxu0 %v1017_v2  ;;  %v1045_v30 = vld [vmem:[%s1281_s3 + $0x70] sm:$0xff]   ;;  %v1047_v32 = vld [vmem:[%s1281_s3 + $0x78] sm:$0xff]   ;;  %v1204_v34 = vld [vmem:[%s1281_s3 + $0x80] sm:$0xff]  }
   0xc   :  { %965 = vmatprep.subr.bf16.mxu0 %v1018_v4  ;;  %v1046_v31 = vld [vmem:[%s1281_s3 + $0x30] sm:$0xff]   ;;  %v1048_v33 = vld [vmem:[%s1281_s3 + $0x38] sm:$0xff]   ;;  %v1210_v35 = vld [vmem:[%s1282_s2] ss:$0 sm:$0xff] }
   0xd   :  { %924 = vmatpush3.bf16.msra.mxu1 %v1036_v21 }
   0xe   :  { %925 = vmatprep.subr.bf16.mxu1 %v1037_v22 }
   0xf   :  { %966 = vmatpush3.bf16.msra.mxu0 %v1018_v4 }
  0x10   :  { %967 = vmatprep.subr.bf16.mxu0 %v1019_v5 }
  0x11   :  { %926 = vmatpush3.bf16.msra.mxu1 %v1038_v23 }
  0x12   :  { %927 = vmatprep.subr.bf16.mxu1 %v1039_v24 }
  0x13   :  { %968 = vmatpush3.bf16.msra.mxu0 %v1019_v5 }
  0x14   :  { %969 = vmatprep.subr.bf16.mxu0 %v1020_v6 }
  0x15   :  { %928 = vmatpush3.bf16.msra.mxu1 %v1040_v25 }
  0x16   :  { %929 = vmatprep.subr.bf16.mxu1 %v1041_v26 }
  0x17   :  { %970 = vmatpush3.bf16.msra.mxu0 %v1020_v6 }
  0x19   :  { %930 = vmatpush3.bf16.msra.mxu1 %v1042_v27 }
  0x1a   :  { %972 = vmatmul.mubr.msk.bf16.vlgmr.msra.gmra.mrb[0].mxu0 %vm160_vm0, %v1022_v7  ;;  %931 = vmatprep.subr.bf16.mxu1 %v1043_v28 }
  0x1b   :  { %975 = vmatprep.mubr.msk.bf16.mxu0 %vm160_vm0, %v1023_v8 }
  0x1d   :  { %932 = vmatpush3.bf16.msra.mxu1 %v1044_v29 }
  0x1e   :  { %933 = vmatprep.subr.bf16.mxu1 %v1045_v30 }
  0x21   :  { %934 = vmatpush3.bf16.msra.mxu1 %v1046_v31 }
  0x22   :  { %976 = vmatmul.mubr.msk.bf16.gmra.mrb[4].mxu0 %vm160_vm0, %v1024_v9  ;;  %935 = vmatprep.subr.bf16.mxu1 %v1047_v32 }
  0x23   :  { %979 = vmatprep.mubr.msk.bf16.mxu0 %vm160_vm0, %v1025_v10 }
  0x25   :  { %936 = vmatpush3.bf16.msra.mxu1 %v1048_v33 }
  0x26   :  { %995 = vmatprep.subr.bf16.mxu1 %v1204_v34 }
  0x2a   :  { %980 = vmatmul.mubr.msk.bf16.gmra.mrb[8].mxu0 %vm160_vm0, %v1026_v11 }
  0x2b   :  { %983 = vmatprep.mubr.msk.bf16.mxu0 %vm160_vm0, %v1027_v12 }
  0x32   :  { %984 = vmatmul.mubr.msk.bf16.gmra.mrb[12].mxu0 %vm160_vm0, %v1028_v13 }
  0x33   :  { %987 = vmatprep.mubr.msk.bf16.mxu0 %vm160_vm0, %v1029_v14 }
  0x3a   :  { %988 = vmatmul.mubr.msk.bf16.gmra.mrb[16].mxu0 %vm160_vm0, %v1030_v15 }
  0x3b   :  { %991 = vmatprep.mubr.msk.bf16.mxu0 %vm160_vm0, %v1031_v16 }
  0x42   :  { %992 = vmatmul.mubr.msk.bf16.gmra.mrb[20].mxu0 %vm160_vm0, %v1032_v17 }
  0xed   :  { %v973_v36 = vpop.f32.mrb[0].mxu0 }
  0xee   :  { %v240_v37 = vadd.f32 %v973_v36, %v1210_v35  ;;  %v231_v38 = vpop.f32.mrb[1].mxu0 }
  0xef   :  { %v232_v39 = vadd.f32 %v1210_v35, %v231_v38  ;;  %v974_v40 = vpop.f32.mrb[2].mxu0 }
  0xf0   :  { %v328_v41 = vmul.f32 0.3, %v240_v37  ;;  %v243_v42 = vadd.f32 %v974_v40, %v1210_v35  ;;  %v234_v43 = vpop.f32.mrb[3].mxu0 }
  0xf1   :  { %v326_v44 = vmul.f32 0.3, %v232_v39  ;;  %v235_v45 = vadd.f32 %v1210_v35, %v234_v43 }
  0xf2   :  { %v352_v46 = vmax.f32 %v240_v37, %v328_v41  ;;  %v329_v47 = vmul.f32 0.3, %v243_v42 }
  0xf3   :  { %v350_v48 = vmax.f32 %v232_v39, %v326_v44  ;;  %v327_v49 = vmul.f32 0.3, %v235_v45 }
  0xf4   :  { %376 = vst [vmem:[#allocation2 + $0x10] sm:$0xff] %v352_v46  ;;  %v353_v50 = vmax.f32 %v243_v42, %v329_v47 }
  0xf5   :  { %374 = vst [vmem:[#allocation2] sm:$0xff] %v350_v48  ;;  %v351_v51 = vmax.f32 %v235_v45, %v327_v49  ;;  %v977_v52 = vpop.f32.mrb[4].mxu0 }
  0xf6   :  { %377 = vst [vmem:[#allocation2 + $0x18] sm:$0xff] %v353_v50  ;;  %v256_v53 = vadd.f32 %v977_v52, %v1210_v35  ;;  %v247_v54 = vpop.f32.mrb[5].mxu0 }
  0xf7   :  { %375 = vst [vmem:[#allocation2 + $0x8] sm:$0xff] %v351_v51  ;;  %v248_v55 = vadd.f32 %v1210_v35, %v247_v54  ;;  %v978_v56 = vpop.f32.mrb[6].mxu0 }
  0xf8   :  { %v332_v57 = vmul.f32 0.3, %v256_v53  ;;  %v259_v58 = vadd.f32 %v978_v56, %v1210_v35  ;;  %v250_v59 = vpop.f32.mrb[7].mxu0 }
  0xf9   :  { %v330_v60 = vmul.f32 0.3, %v248_v55  ;;  %v251_v61 = vadd.f32 %v1210_v35, %v250_v59 }
  0xfa   :  { %v356_v62 = vmax.f32 %v256_v53, %v332_v57  ;;  %v333_v63 = vmul.f32 0.3, %v259_v58 }
  0xfb   :  { %v354_v0 = vmax.f32 %v248_v55, %v330_v60  ;;  %v331_v1 = vmul.f32 0.3, %v251_v61 }
  0xfc   :  { %380 = vst [vmem:[#allocation2 + $0x30] sm:$0xff] %v356_v62  ;;  %v357_v2 = vmax.f32 %v259_v58, %v333_v63 }
  0xfd   :  { %378 = vst [vmem:[#allocation2 + $0x20] sm:$0xff] %v354_v0  ;;  %v355_v3 = vmax.f32 %v251_v61, %v331_v1  ;;  %v981_v4 = vpop.f32.mrb[8].mxu0 }
  0xfe   :  { %381 = vst [vmem:[#allocation2 + $0x38] sm:$0xff] %v357_v2  ;;  %v272_v5 = vadd.f32 %v981_v4, %v1210_v35  ;;  %v263_v6 = vpop.f32.mrb[9].mxu0  ;;  %v398_v16 = vld [vmem:[#allocation2] ss:$4 sm:$0xff]  ;;  %v410_v17 = vld [vmem:[#allocation2 + $0x1] ss:$4 sm:$0xff] }
  0xff   :  { %379 = vst [vmem:[#allocation2 + $0x28] sm:$0xff] %v355_v3  ;;  %v264_v7 = vadd.f32 %v1210_v35, %v263_v6  ;;  %v982_v8 = vpop.f32.mrb[10].mxu0  ;;  %v428_v20 = vld [vmem:[#allocation2 + $0x2] ss:$4 sm:$0xff]  ;;  %v440_v21 = vld [vmem:[#allocation2 + $0x3] ss:$4 sm:$0xff]  ;;  %v421_v29 = vmax.f32 %v398_v16, %v410_v17 }
 0x100   :  { %v336_v9 = vmul.f32 0.3, %v272_v5  ;;  %v275_v10 = vadd.f32 %v982_v8, %v1210_v35  ;;  %v266_v11 = vpop.f32.mrb[11].mxu0  ;;  %v451_v30 = vmax.f32 %v428_v20, %v440_v21 }
 0x101   :  { %v334_v12 = vmul.f32 0.3, %v264_v7  ;;  %v267_v13 = vadd.f32 %v1210_v35, %v266_v11 }
 0x102   :  { %v360_v14 = vmax.f32 %v272_v5, %v336_v9  ;;  %v337_v15 = vmul.f32 0.3, %v275_v10  ;;  %v457_v46 = vmax.f32 %v421_v29, %v451_v30  ;;  %v1050_v29 = vld [vmem:[%s1281_s3 + $0x88] sm:$0xff]  }
 0x103   :  { %v358_v18 = vmax.f32 %v264_v7, %v334_v12  ;;  %v335_v19 = vmul.f32 0.3, %v267_v13 }
 0x104   :  { %384 = vst [vmem:[#allocation2 + $0x50] sm:$0xff] %v360_v14  ;;  %v361_v22 = vmax.f32 %v275_v10, %v337_v15 }
 0x105   :  { %382 = vst [vmem:[#allocation2 + $0x40] sm:$0xff] %v358_v18  ;;  %v359_v23 = vmax.f32 %v267_v13, %v335_v19  ;;  %v985_v24 = vpop.f32.mrb[12].mxu0 }
 0x106   :  { %385 = vst [vmem:[#allocation2 + $0x58] sm:$0xff] %v361_v22  ;;  %v288_v25 = vadd.f32 %v985_v24, %v1210_v35  ;;  %v279_v26 = vpop.f32.mrb[13].mxu0  ;;  %v400_v27 = vld [vmem:[#allocation2 + $0x20] ss:$4 sm:$0xff]  ;;  %v412_v28 = vld [vmem:[#allocation2 + $0x21] ss:$4 sm:$0xff] }
 0x107   :  { %383 = vst [vmem:[#allocation2 + $0x48] sm:$0xff] %v359_v23  ;;  %v280_v31 = vadd.f32 %v1210_v35, %v279_v26  ;;  %v986_v32 = vpop.f32.mrb[14].mxu0  ;;  %v422_v33 = vmax.f32 %v400_v27, %v412_v28  ;;  %v430_v36 = vld [vmem:[#allocation2 + $0x22] ss:$4 sm:$0xff]  ;;  %v442_v37 = vld [vmem:[#allocation2 + $0x23] ss:$4 sm:$0xff] }
 0x108   :  { %v340_v38 = vmul.f32 0.3, %v288_v25  ;;  %v291_v39 = vadd.f32 %v986_v32, %v1210_v35  ;;  %v282_v40 = vpop.f32.mrb[15].mxu0  ;;  %v452_v41 = vmax.f32 %v430_v36, %v442_v37 }
 0x109   :  { %v338_v42 = vmul.f32 0.3, %v280_v31  ;;  %v283_v43 = vadd.f32 %v1210_v35, %v282_v40 }
 0x10a   :  { %v364_v44 = vmax.f32 %v288_v25, %v340_v38  ;;  %v341_v45 = vmul.f32 0.3, %v291_v39  ;;  %v458_v47 = vmax.f32 %v422_v33, %v452_v41 }
 0x10b   :  { %v362_v48 = vmax.f32 %v280_v31, %v338_v42  ;;  %v339_v49 = vmul.f32 0.3, %v283_v43  ;;  %v1051_v42 = vld [vmem:[%s1281_s3 + $0x90] sm:$0xff]  }
 0x10c   :  { %388 = vst [vmem:[#allocation2 + $0x70] sm:$0xff] %v364_v44  ;;  %v365_v50 = vmax.f32 %v291_v39, %v341_v45  ;;  %v1228_v51 = vpack.c.bf16 %v458_v47, %v457_v46 }
 0x10d   :  { %386 = vst [vmem:[#allocation2 + $0x60] sm:$0xff] %v362_v48  ;;  %v363_v52 = vmax.f32 %v283_v43, %v339_v49  ;;  %v989_v53 = vpop.f32.mrb[16].mxu0 }
 0x10e   :  { %389 = vst [vmem:[#allocation2 + $0x78] sm:$0xff] %v365_v50  ;;  %v304_v54 = vadd.f32 %v989_v53, %v1210_v35  ;;  %v295_v55 = vpop.f32.mrb[17].mxu0  ;;  %v402_v56 = vld [vmem:[#allocation2 + $0x40] ss:$4 sm:$0xff]  ;;  %v414_v57 = vld [vmem:[#allocation2 + $0x41] ss:$4 sm:$0xff] }
 0x10f   :  { %387 = vst [vmem:[#allocation2 + $0x68] sm:$0xff] %v363_v52  ;;  %v296_v58 = vadd.f32 %v1210_v35, %v295_v55  ;;  %v990_v59 = vpop.f32.mrb[18].mxu0  ;;  %v423_v60 = vmax.f32 %v402_v56, %v414_v57  ;;  %v432_v61 = vld [vmem:[#allocation2 + $0x42] ss:$4 sm:$0xff]  ;;  %v444_v62 = vld [vmem:[#allocation2 + $0x43] ss:$4 sm:$0xff] }
 0x110   :  { %v344_v63 = vmul.f32 0.3, %v304_v54  ;;  %v307_v0 = vadd.f32 %v990_v59, %v1210_v35  ;;  %v298_v1 = vpop.f32.mrb[19].mxu0  ;;  %v453_v2 = vmax.f32 %v432_v61, %v444_v62  ;;  %v471_v3 = vshll.u32 %v1228_v51, 16  ;;  %v1053_v55 = vld [vmem:[%s1281_s3 + $0xa0] sm:$0xff]  }
 0x111   :  { %v342_v4 = vmul.f32 0.3, %v296_v58  ;;  %v299_v5 = vadd.f32 %v1210_v35, %v298_v1  ;;  %v469_v18 = vshrl.u32 %v1228_v51, 16 }
 0x112   :  { %v368_v6 = vmax.f32 %v304_v54, %v344_v63  ;;  %v345_v7 = vmul.f32 0.3, %v307_v0  ;;  %v459_v8 = vmax.f32 %v423_v60, %v453_v2  ;;  %v473_v13 = vrot.slane %v471_v3, 1  ;;  %v1054_v63 = vld [vmem:[%s1281_s3 + $0xa8] sm:$0xff]  }
 0x113   :  { %v366_v9 = vmax.f32 %v296_v58, %v342_v4  ;;  %v343_v10 = vmul.f32 0.3, %v299_v5 }
 0x114   :  { %392 = vst [vmem:[#allocation2 + $0x90] sm:$0xff] %v368_v6  ;;  %v369_v11 = vmax.f32 %v307_v0, %v345_v7  ;;  %v1235_v12 = vpack.c.bf16 %v459_v8, %v459_v8  ;;  %v474_v25 = vor.u32 %v473_v13, %v469_v18 }
 0x115   :  { %390 = vst [vmem:[#allocation2 + $0x80] sm:$0xff] %v366_v9  ;;  %v367_v14 = vmax.f32 %v299_v5, %v343_v10  ;;  %v993_v15 = vpop.f32.mrb[20].mxu0  ;;  %v1055_v5 = vld [vmem:[%s1281_s3 + $0xb0] sm:$0xff]   ;;  %v499_v10 = vrot.slane %v1228_v51, 1 }
 0x116   :  { %393 = vst [vmem:[#allocation2 + $0x98] sm:$0xff] %v369_v11  ;;  %v320_v16 = vadd.f32 %v993_v15, %v1210_v35  ;;  %v311_v17 = vpop.f32.mrb[21].mxu0  ;;  %v476_v19 = vshll.u32 %v1235_v12, 16  ;;  %v404_v33 = vld [vmem:[#allocation2 + $0x60] ss:$4 sm:$0xff]  ;;  %v500_v8 = vrot.slane %v1235_v12, 1 }
 0x117   :  { %391 = vst [vmem:[#allocation2 + $0x88] sm:$0xff] %v367_v14  ;;  %v312_v20 = vadd.f32 %v1210_v35, %v311_v17  ;;  %v994_v21 = vpop.f32.mrb[22].mxu0  ;;  %v416_v36 = vld [vmem:[#allocation2 + $0x61] ss:$4 sm:$0xff]  ;;  %v434_v39 = vld [vmem:[#allocation2 + $0x62] ss:$4 sm:$0xff] }
 0x118   :  { %v348_v22 = vmul.f32 0.3, %v320_v16  ;;  %v323_v23 = vadd.f32 %v994_v21, %v1210_v35  ;;  %v314_v24 = vpop.f32.mrb[23].mxu0  ;;  %v478_v26 = vrot.slane %v476_v19, 1  ;;  %v446_v40 = vld [vmem:[#allocation2 + $0x63] ss:$4 sm:$0xff]  ;;  %v424_v45 = vmax.f32 %v404_v33, %v416_v36 }
 0x119   :  { %v346_v27 = vmul.f32 0.3, %v312_v20  ;;  %v315_v28 = vadd.f32 %v1210_v35, %v314_v24  ;;  %v454_v47 = vmax.f32 %v434_v39, %v446_v40  ;;  %v1056_v11 = vld [vmem:[%s1281_s3 + $0xb8] sm:$0xff]   ;;  %v501_v13 = vsel %vm498_vm2, %v499_v10, %v500_v8 }
 0x11a   :  { %v372_v30 = vmax.f32 %v320_v16, %v348_v22  ;;  %v349_v31 = vmul.f32 0.3, %v323_v23  ;;  %v479_v32 = vsel %vm467_vm1, %v474_v25, %v478_v26 }
 0x11b   :  { %v370_v37 = vmax.f32 %v312_v20, %v346_v27  ;;  %v347_v38 = vmul.f32 0.3, %v315_v28  ;;  %738 = vmatprep.mubr.bf16.mxu1 %v479_v32  ;;  %v460_v52 = vmax.f32 %v424_v45, %v454_v47  ;;  %v859_v27 = vld [vmem:[%s1283_s4] ss:$0 sm:$0xff] }
 0x11c   :  { %396 = vst [vmem:[#allocation2 + $0xb0] sm:$0xff] %v372_v30  ;;  %v373_v41 = vmax.f32 %v323_v23, %v349_v31  ;;  %739 = vmatmul.mubr.bf16.vlgmr.msra.gmra.mrb[0].mxu1 %v1228_v51 }
 0x11d   :  { %394 = vst [vmem:[#allocation2 + $0xa0] sm:$0xff] %v370_v37  ;;  %v371_v35 = vmax.f32 %v315_v28, %v347_v38  ;;  %996 = vmatpush3.bf16.msra.mxu1 %v1204_v34  ;;  %v1052_v34 = vld [vmem:[%s1281_s3 + $0x98] sm:$0xff]  }
 0x11e   :  { %397 = vst [vmem:[#allocation2 + $0xb8] sm:$0xff] %v373_v41  ;;  %997 = vmatprep.subr.bf16.mxu1 %v1050_v29  ;;  %v406_v43 = vld [vmem:[#allocation2 + $0x80] ss:$4 sm:$0xff]  ;;  %v418_v44 = vld [vmem:[#allocation2 + $0x81] ss:$4 sm:$0xff] }
 0x11f   :  { %v436_v46 = vld [vmem:[#allocation2 + $0x82] ss:$4 sm:$0xff]  ;;  %395 = vst [vmem:[#allocation2 + $0xa8] sm:$0xff] %v371_v35  ;;  %v425_v48 = vmax.f32 %v406_v43, %v418_v44  ;;  %v448_v49 = vld [vmem:[#allocation2 + $0x83] ss:$4 sm:$0xff] }
 0x120   :  { %v455_v50 = vmax.f32 %v436_v46, %v448_v49 }
 0x121   :  { %998 = vmatpush3.bf16.msra.mxu1 %v1050_v29 }
 0x122   :  { %999 = vmatprep.subr.bf16.mxu1 %v1051_v42  ;;  %v461_v53 = vmax.f32 %v425_v48, %v455_v50 }
 0x124   :  { %v465_v54 = vpack.c.bf16 %v461_v53, %v460_v52 }
 0x125   :  { %1000 = vmatpush3.bf16.msra.mxu1 %v1051_v42 }
 0x126   :  { %1001 = vmatprep.subr.bf16.mxu1 %v1052_v34  ;;  %v408_v56 = vld [vmem:[#allocation2 + $0xa0] ss:$4 sm:$0xff]  ;;  %v420_v57 = vld [vmem:[#allocation2 + $0xa1] ss:$4 sm:$0xff]  ;;  %v438_v58 = vld [vmem:[#allocation2 + $0xa2] ss:$4 sm:$0xff] }
 0x127   :  { %v426_v59 = vmax.f32 %v408_v56, %v420_v57  ;;  %v450_v60 = vld [vmem:[#allocation2 + $0xa3] ss:$4 sm:$0xff]  ;;  %v483_v62 = vshll.u32 %v465_v54, 16  ;;  %v481_v3 = vshrl.u32 %v465_v54, 16  ;;  %v502_v12 = vrot.slane %v465_v54, 1 }
 0x128   :  { %v456_v61 = vmax.f32 %v438_v58, %v450_v60 }
 0x129   :  { %1002 = vmatpush3.bf16.msra.mxu1 %v1052_v34  ;;  %v485_v2 = vrot.slane %v483_v62, 1 }
 0x12a   :  { %1003 = vmatprep.subr.bf16.mxu1 %v1053_v55  ;;  %v462_v0 = vmax.f32 %v426_v59, %v456_v61 }
 0x12b   :  { %v486_v6 = vor.u32 %v485_v2, %v481_v3 }
 0x12c   :  { %v466_v1 = vpack.c.bf16 %v462_v0, %v462_v0 }
 0x12d   :  { %1004 = vmatpush3.bf16.msra.mxu1 %v1053_v55 }
 0x12e   :  { %1005 = vmatprep.subr.bf16.mxu1 %v1054_v63  ;;  %v488_v4 = vshll.u32 %v466_v1, 16  ;;  %v503_v14 = vrot.slane %v466_v1, 1 }
 0x130   :  { %v490_v7 = vrot.slane %v488_v4, 1  ;;  %v504_v15 = vsel %vm498_vm2, %v502_v12, %v503_v14 }
 0x131   :  { %1006 = vmatpush3.bf16.msra.mxu1 %v1054_v63 }
 0x132   :  { %v491_v9 = vsel %vm467_vm1, %v486_v6, %v490_v7  ;;  %1007 = vmatprep.subr.bf16.mxu1 %v1055_v5 }
 0x133   :  { %746 = vmatprep.mubr.bf16.mxu1 %v491_v9 }
 0x134   :  { %747 = vmatmul.mubr.bf16.gmra.mrb[4].mxu1 %v465_v54 }
 0x135   :  { %1008 = vmatpush3.bf16.msra.mxu1 %v1055_v5  ;;  %1011 = vmatprep.mubr.bf16.mxu1 %v501_v13 }
 0x136   :  { %1009 = vmatprep.subr.bf16.mxu1 %v1056_v11 }
 0x139   :  { %1010 = vmatpush3.bf16.msra.mxu1 %v1056_v11 }
 0x13c   :  { %1012 = vmatmul.mubr.bf16.vlgmr.msra.gmra.mrb[8].mxu1 %v504_v15 }
 0x1ef   :  { %v937_v16 = vpop.f32.mrb[0].mxu1 }
 0x1f0   :  { %v938_v17 = vpop.f32.mrb[1].mxu1 }
 0x1f1   :  { %v939_v18 = vadd.f32 %v938_v17, %v937_v16  ;;  %v940_v19 = vpop.f32.mrb[2].mxu1 }
 0x1f2   :  { %v941_v51 = vpop.f32.mrb[3].mxu1 }
 0x1f3   :  { %v942_v20 = vadd.f32 %v941_v51, %v940_v19  ;;  %v741_v30 = vadd.f32 %v939_v18, %v859_v27 }
 0x1f5   :  { %v744_v38 = vadd.f32 %v942_v20, %v859_v27 }
 0x207   :  { %v943_v21 = vpop.f32.mrb[4].mxu1 }
 0x208   :  { %v944_v22 = vpop.f32.mrb[5].mxu1 }
 0x209   :  { %v945_v23 = vadd.f32 %v944_v22, %v943_v21  ;;  %v946_v24 = vpop.f32.mrb[6].mxu1 }
 0x20a   :  { %v947_v25 = vpop.f32.mrb[7].mxu1 }
 0x20b   :  { %v948_v26 = vadd.f32 %v947_v25, %v946_v24  ;;  %v749_v28 = vadd.f32 %v945_v23, %v859_v27 }
 0x20d   :  { %v752_v33 = vadd.f32 %v948_v26, %v859_v27 }
 0x20f   :  { %v1013_v29 = vpop.f32.mrb[8].mxu1 }
 0x210   :  { %v798_v31 = vadd.f32 %v1013_v29, %v749_v28  ;;  %v789_v32 = vpop.f32.mrb[9].mxu1 }
 0x211   :  { %v790_v36 = vadd.f32 %v789_v32, %v741_v30  ;;  %v1014_v37 = vpop.f32.mrb[10].mxu1 }
 0x212   :  { %v801_v39 = vadd.f32 %v1014_v37, %v752_v33  ;;  %v792_v40 = vpop.f32.mrb[11].mxu1 }
 0x213   :  { %v793_v41 = vadd.f32 %v792_v40, %v744_v38 }
 0x214   :  { %v900_v35 = vpack.c.bf16 %v801_v39, %v798_v31 }
 0x215   :  { %v895_v42 = vpack.c.bf16 %v793_v41, %v790_v36 }
 0x216   :  { %902 = vst [vmem:[%s1284_s5 + $0x8] sm:$0xff] %v900_v35  }
 0x217   :  { %896 = vst [vmem:[%s1284_s5] sm:$0xff] %v895_v42  }

</bundles_post_ra>
